<compile_context>
chip_gen: v6e
topology: v6e:2x2x1
jax: 0.10.0
libtpu: 0.0.40
codegen_flags: <defaults>
</compile_context>

<pallas_src>
import jax
import jax.numpy as jnp
from jax.experimental import pallas as pl
from jax.experimental.pallas import tpu as pltpu


def _round_up(x, m):
    return ((x + m - 1) // m) * m


def _cdiv(a, b):
    return (a + b - 1) // b


def _vmem_budget_bytes():
    """~70% of physical VMEM; conservative fallback fits v7x's 64 MiB/TC."""
    try:
        cap = getattr(pltpu.get_tpu_info(), "vmem_capacity_bytes", None)
        if cap:
            return int(cap * 0.7)
    except Exception:
        pass
    return 44 * 1024 * 1024


# ---------------------------- kernels ----------------------------

def _ffn_resident_kernel(x_ref, w1_ref, b1_ref, w2_ref, b2_ref, o_ref):
    """Weights fully resident in VMEM; single grid axis over row tiles."""
    xb = x_ref[...].astype(w1_ref.dtype)                      # cast in-kernel
    hidden = jnp.dot(xb, w1_ref[...], preferred_element_type=jnp.float32)
    hidden = jnp.maximum(hidden + b1_ref[...], 0.0)            # bias + ReLU (f32)
    out = jnp.dot(hidden.astype(w2_ref.dtype), w2_ref[...],
                  preferred_element_type=jnp.float32)
    o_ref[...] = (out + b2_ref[...]).astype(o_ref.dtype)


def _ffn_streamed_kernel(x_ref, w1_ref, b1_ref, w2_ref, b2_ref, o_ref, acc_ref):
    """H streamed as an innermost reduction axis; f32 accumulator in VMEM."""
    h_idx = pl.program_id(1)
    last = pl.num_programs(1) - 1

    xb = x_ref[...].astype(w1_ref.dtype)
    hidden = jnp.dot(xb, w1_ref[...], preferred_element_type=jnp.float32)
    hidden = jnp.maximum(hidden + b1_ref[...], 0.0)
    partial = jnp.dot(hidden.astype(w2_ref.dtype), w2_ref[...],
                      preferred_element_type=jnp.float32)

    @pl.when(h_idx == 0)
    def _():
        acc_ref[...] = jnp.zeros_like(acc_ref)

    @pl.when(h_idx != last)
    def _():
        acc_ref[...] += partial

    # Fold the last partial product straight into the store (saves one full
    # (bm, C) f32 VMEM store + reload per m-tile).
    @pl.when(h_idx == last)
    def _():
        o_ref[...] = (acc_ref[...] + partial + b2_ref[...]).astype(o_ref.dtype)


# ---------------------------- wrapper ----------------------------

def feed_forward(x, w1, b1, w2, b2, *, block_m=512, block_h=512,
                 compute_dtype=jnp.bfloat16, force_streamed=False):
    """Eval-mode FFN. x: (B, T, C) -> (B, T, C).

    w1: (C, H), b1: (H,), w2: (H, C), b2: (C,) with H = 4*C
    (weights stored transposed relative to nn.Linear, i.e. x @ W).
    Weights should be pre-cast to `compute_dtype` by the caller (the wrapper
    only casts if they are not).
    """
    B, T, C = x.shape
    Cw, H = w1.shape
    assert Cw == C and w2.shape == (H, C) and b1.shape == (H,) and b2.shape == (C,)
    M = B * T
    out_dtype = x.dtype

    # Weights: cast once only if the caller did not pre-cast.
    w1c = w1 if w1.dtype == compute_dtype else w1.astype(compute_dtype)
    w2c = w2 if w2.dtype == compute_dtype else w2.astype(compute_dtype)
    b1_2d = b1.reshape(1, H).astype(jnp.float32)
    b2_2d = b2.reshape(1, C).astype(jnp.float32)

    x_bytes = jnp.dtype(x.dtype).itemsize
    out_bytes = jnp.dtype(out_dtype).itemsize
    w_bytes = jnp.dtype(compute_dtype).itemsize
    budget = _vmem_budget_bytes()

    # Row tile: favour >= 2 m-tiles so v7x's two TensorCores both get work.
    bm = min(block_m, _round_up(M, 8))
    if M > 8 and _round_up(M, bm) // bm < 2:
        bm = _round_up(_cdiv(M, 2), 8)

    def resident_fp(bm_):
        weights = 2 * C * H * w_bytes + (H + C) * 4            # W1+W2 (single copy) + biases
        stream = 2 * bm_ * C * (x_bytes + out_bytes)           # double-buffered x/out tiles
        temps = bm_ * H * (4 + w_bytes) + bm_ * C * 4          # hidden f32 + bf16, out f32
        return weights + stream + temps

    def streamed_fp(bm_, bh_):
        tiles = (2 * bm_ * C * x_bytes + 2 * C * bh_ * w_bytes
                 + 2 * bh_ * C * w_bytes + 2 * bh_ * 4 + 2 * C * 4
                 + 2 * bm_ * C * out_bytes)
        temps = bm_ * C * 4 + bm_ * bh_ * (4 + w_bytes)
        return tiles + temps

    # ---- choose path ----
    bh = H
    use_resident = not force_streamed
    if use_resident:
        bm_r = bm
        while resident_fp(bm_r) > budget and bm_r > 64:
            bm_r = max(64, _round_up(bm_r // 2, 8))
        use_resident = resident_fp(bm_r) <= budget
        if use_resident:
            bm = bm_r

    if not use_resident:
        # Hidden tile: largest multiple of 128 that divides H and is <= block_h.
        if H % 128 == 0:
            for cand in range(128, min(block_h, H) + 1, 128):
                if H % cand == 0:
                    bh = cand
        while streamed_fp(bm, bh) > budget and bm > 128:
            bm = max(128, _round_up(bm // 2, 8))

    M_pad = _round_up(M, bm)
    m_tiles = M_pad // bm

    x2d = x.reshape(M, C)
    if M_pad != M:
        x2d = jnp.pad(x2d, ((0, M_pad - M), (0, 0)))

    # Explicit VMEM limit derived from the actual footprint (never above budget).
    fp = resident_fp(bm) if use_resident else streamed_fp(bm, bh)
    vmem_limit = int(min(budget, max(32 * 1024 * 1024, fp + 4 * 1024 * 1024)))

    weight_hbm = 2 * C * H * w_bytes * (1 if use_resident else m_tiles)
    cost = pl.CostEstimate(
        flops=4 * M_pad * C * H,                               # two matmuls
        transcendentals=0,
        bytes_accessed=(M_pad * C * x_bytes + weight_hbm + (H + C) * 4
                        + M_pad * C * out_bytes))

    if use_resident:
        grid_spec = pltpu.PrefetchScalarGridSpec(
            num_scalar_prefetch=0,
            grid=(m_tiles,),
            in_specs=[
                pl.BlockSpec((bm, C), lambda i: (i, 0)),                   # x row tile
                pl.BlockSpec(memory_space=pltpu.MemorySpace.VMEM),         # W1 resident
                pl.BlockSpec(memory_space=pltpu.MemorySpace.VMEM),         # b1 resident
                pl.BlockSpec(memory_space=pltpu.MemorySpace.VMEM),         # W2 resident
                pl.BlockSpec(memory_space=pltpu.MemorySpace.VMEM),         # b2 resident
            ],
            out_specs=pl.BlockSpec((bm, C), lambda i: (i, 0)),
            scratch_shapes=[],
        )
        kernel = _ffn_resident_kernel
        dims = ("parallel",)
    else:
        h_tiles = H // bh
        grid_spec = pltpu.PrefetchScalarGridSpec(
            num_scalar_prefetch=0,
            grid=(m_tiles, h_tiles),                           # reduction (h) innermost
            in_specs=[
                pl.BlockSpec((bm, C), lambda i, h: (i, 0)),    # x row tile
                pl.BlockSpec((C, bh), lambda i, h: (0, h)),    # W1 column slice
                pl.BlockSpec((1, bh), lambda i, h: (0, h)),    # b1 slice
                pl.BlockSpec((bh, C), lambda i, h: (h, 0)),    # W2 row slice
                pl.BlockSpec((1, C), lambda i, h: (0, 0)),     # b2 (constant)
            ],
            out_specs=pl.BlockSpec((bm, C), lambda i, h: (i, 0)),
            scratch_shapes=[pltpu.VMEM((bm, C), jnp.float32)],  # f32 accumulator
        )
        kernel = _ffn_streamed_kernel
        dims = ("parallel", "arbitrary")

    out2d = pl.pallas_call(
        kernel,
        out_shape=jax.ShapeDtypeStruct((M_pad, C), out_dtype),
        grid_spec=grid_spec,
        compiler_params=pltpu.CompilerParams(
            dimension_semantics=dims,
            vmem_limit_bytes=vmem_limit),
        cost_estimate=cost,
    )(x2d, w1c, b1_2d, w2c, b2_2d)

    if M_pad != M:
        out2d = out2d[:M]
    return out2d.reshape(B, T, C)


def init_params(key, n_embd, dtype=jnp.float32):
    """Deterministic init matching nn.Linear shapes (stored transposed)."""
    h = 4 * n_embd
    k1, k2, k3, k4 = jax.random.split(key, 4)
    lim1 = 1.0 / jnp.sqrt(n_embd)   # PyTorch Linear default: U(+-1/sqrt(fan_in))
    lim2 = 1.0 / jnp.sqrt(h)
    w1 = jax.random.uniform(k1, (n_embd, h), dtype, -lim1, lim1)
    b1 = jax.random.uniform(k2, (h,), dtype, -lim1, lim1)
    w2 = jax.random.uniform(k3, (h, n_embd), dtype, -lim2, lim2)
    b2 = jax.random.uniform(k4, (n_embd,), dtype, -lim2, lim2)
    return w1, b1, w2, b2


if __name__ == "__main__":
    n_embd = 64        # -> hidden = 256
    batch, seq = 2, 8

    key = jax.random.PRNGKey(0)
    kx, kp = jax.random.split(key)
    x = jax.random.normal(kx, (batch, seq, n_embd), jnp.float32)
    w1, b1, w2, b2 = init_params(kp, n_embd)

    # Pre-cast weights to the MXU compute dtype once (hoisted out of the call path).
    w1c = w1.astype(jnp.bfloat16)
    w2c = w2.astype(jnp.bfloat16)

    # Default: weights-resident fast path.
    out = feed_forward(x, w1c, b1, w2c, b2)
    out = jax.block_until_ready(out)
    assert out.shape == (batch, seq, n_embd)

    # Also exercise the H-streamed fallback path (used when weights don't fit VMEM).
    out_streamed = feed_forward(x, w1c, b1, w2c, b2, block_h=128, force_streamed=True)
    out_streamed = jax.block_until_ready(out_streamed)
    assert out_streamed.shape == (batch, seq, n_embd)

    # Reference 1: same mixed precision (bf16 operands, f32 accumulation).
    xb = x.reshape(-1, n_embd).astype(jnp.bfloat16)
    h_ref = jnp.maximum(
        jnp.dot(xb, w1.astype(jnp.bfloat16), preferred_element_type=jnp.float32)
        + b1, 0.0)
    ref_mixed = (jnp.dot(h_ref.astype(jnp.bfloat16), w2.astype(jnp.bfloat16),
                         preferred_element_type=jnp.float32)
                 + b2).reshape(batch, seq, n_embd)
    assert jnp.allclose(out, ref_mixed, atol=5e-3, rtol=5e-3)
    assert jnp.allclose(out_streamed, ref_mixed, atol=5e-3, rtol=5e-3)

    # Reference 2: pure f32 math (looser tolerance for bf16 operand rounding).
    ref_f32 = jnp.maximum(x @ w1 + b1, 0.0) @ w2 + b2
    assert jnp.allclose(out, ref_f32, atol=5e-2, rtol=5e-2)

    print("KERNEL_OK")
</pallas_src>

<mosaic_0001>
module attributes {stable_mosaic.version = 11 : i64} {
  func.func @_ffn_resident_kernel(%arg0: i32, %arg1: memref<8x64xf32, #tpu.memory_space<vmem>>, %arg2: memref<64x256xbf16, #tpu.memory_space<vmem>>, %arg3: memref<1x256xf32, #tpu.memory_space<vmem>>, %arg4: memref<256x64xbf16, #tpu.memory_space<vmem>>, %arg5: memref<1x64xf32, #tpu.memory_space<vmem>>, %arg6: memref<8x64xf32, #tpu.memory_space<vmem>>) attributes {dimension_semantics = [#tpu.dimension_semantics<parallel>], iteration_bounds = array<i64: 2>, scalar_prefetch = 0 : i64, scratch_operands = 0 : i64, tpu.core_type = #tpu.core_type<tc>, window_params = [{transform_indices = @transform_0, window_bounds = array<i64: 8, 64>}, {pipeline_mode = #tpu.pipeline_mode<synchronous>, transform_indices = @transform_1, window_bounds = array<i64: 64, 256>}, {pipeline_mode = #tpu.pipeline_mode<synchronous>, transform_indices = @transform_2, window_bounds = array<i64: 1, 256>}, {pipeline_mode = #tpu.pipeline_mode<synchronous>, transform_indices = @transform_3, window_bounds = array<i64: 256, 64>}, {pipeline_mode = #tpu.pipeline_mode<synchronous>, transform_indices = @transform_4, window_bounds = array<i64: 1, 64>}, {transform_indices = @transform_5, window_bounds = array<i64: 8, 64>}]} {
    %c0 = arith.constant 0 : index
    %c0_0 = arith.constant 0 : index
    %0 = vector.load %arg1[%c0, %c0_0] : memref<8x64xf32, #tpu.memory_space<vmem>>, vector<8x64xf32>
    %1 = arith.truncf %0 : vector<8x64xf32> to vector<8x64xbf16>
    %c0_1 = arith.constant 0 : index
    %c0_2 = arith.constant 0 : index
    %2 = vector.load %arg2[%c0_1, %c0_2] : memref<64x256xbf16, #tpu.memory_space<vmem>>, vector<64x256xbf16>
    %cst = arith.constant dense<0.000000e+00> : vector<8x256xf32>
    %3 = tpu.matmul %1, %2, %cst {dimension_numbers = #tpu.dot_dimension_numbers<[1], [0], [0], [1], [0, 0, 1, 1], [], []>} : vector<8x64xbf16>, vector<64x256xbf16>, vector<8x256xf32> -> vector<8x256xf32>
    %c0_3 = arith.constant 0 : index
    %c0_4 = arith.constant 0 : index
    %4 = vector.load %arg3[%c0_3, %c0_4] : memref<1x256xf32, #tpu.memory_space<vmem>>, vector<1x256xf32>
    %5 = vector.broadcast %4 : vector<1x256xf32> to vector<8x256xf32>
    %6 = arith.addf %3, %5 : vector<8x256xf32>
    %cst_5 = arith.constant 0.000000e+00 : f32
    %7 = vector.broadcast %cst_5 : f32 to vector<8x256xf32>
    %8 = arith.maximumf %6, %7 : vector<8x256xf32>
    %9 = arith.truncf %8 : vector<8x256xf32> to vector<8x256xbf16>
    %c0_6 = arith.constant 0 : index
    %c0_7 = arith.constant 0 : index
    %10 = vector.load %arg4[%c0_6, %c0_7] : memref<256x64xbf16, #tpu.memory_space<vmem>>, vector<256x64xbf16>
    %cst_8 = arith.constant dense<0.000000e+00> : vector<8x64xf32>
    %11 = tpu.matmul %9, %10, %cst_8 {dimension_numbers = #tpu.dot_dimension_numbers<[1], [0], [0], [1], [0, 0, 1, 1], [], []>} : vector<8x256xbf16>, vector<256x64xbf16>, vector<8x64xf32> -> vector<8x64xf32>
    %c0_9 = arith.constant 0 : index
    %c0_10 = arith.constant 0 : index
    %12 = vector.load %arg5[%c0_9, %c0_10] : memref<1x64xf32, #tpu.memory_space<vmem>>, vector<1x64xf32>
    %13 = vector.broadcast %12 : vector<1x64xf32> to vector<8x64xf32>
    %14 = arith.addf %11, %13 : vector<8x64xf32>
    %c0_11 = arith.constant 0 : index
    %c0_12 = arith.constant 0 : index
    %15 = vector.load %arg6[%c0_11, %c0_12] : memref<8x64xf32, #tpu.memory_space<vmem>>, vector<8x64xf32>
    tpu.vector_store %arg6[%c0_11, %c0_12], %14 {strides = array<i32>} : memref<8x64xf32, #tpu.memory_space<vmem>>, vector<8x64xf32>,
    return
  }
  func.func @transform_0(%arg0: i32) -> (i32, i32) {
    %c0_i32 = arith.constant 0 : i32
    %c0_i32_0 = arith.constant 0 : i32
    return %arg0, %c0_i32 : i32, i32
  }
  func.func @transform_1(%arg0: i32) -> (i32, i32) {
    %c0_i32 = arith.constant 0 : i32
    %c0_i32_0 = arith.constant 0 : i32
    %c0_i32_1 = arith.constant 0 : i32
    return %c0_i32, %c0_i32_0 : i32, i32
  }
  func.func @transform_2(%arg0: i32) -> (i32, i32) {
    %c0_i32 = arith.constant 0 : i32
    %c0_i32_0 = arith.constant 0 : i32
    %c0_i32_1 = arith.constant 0 : i32
    return %c0_i32, %c0_i32_0 : i32, i32
  }
  func.func @transform_3(%arg0: i32) -> (i32, i32) {
    %c0_i32 = arith.constant 0 : i32
    %c0_i32_0 = arith.constant 0 : i32
    %c0_i32_1 = arith.constant 0 : i32
    return %c0_i32, %c0_i32_0 : i32, i32
  }
  func.func @transform_4(%arg0: i32) -> (i32, i32) {
    %c0_i32 = arith.constant 0 : i32
    %c0_i32_0 = arith.constant 0 : i32
    %c0_i32_1 = arith.constant 0 : i32
    return %c0_i32, %c0_i32_0 : i32, i32
  }
  func.func @transform_5(%arg0: i32) -> (i32, i32) {
    %c0_i32 = arith.constant 0 : i32
    %c0_i32_0 = arith.constant 0 : i32
    return %arg0, %c0_i32 : i32, i32
  }
}

</mosaic_0001>

<bundles_post_ra>
// kernel: tpu_custom_call.1
= control target key start
LH: loop header
LB: loop body
LE: loop exit
PB: predicated region body
PF: predicated region fallthrough
CT: control target
= control target key end

     0   :  { %10 = vsyncpa [#allocation3], 0  ;;  %s974_s0 = inlined_call_operand.vmem [shape: f32[16,64], index: 0, kind: input, shape index: {}]   ;;  %s975_s1 = inlined_call_operand.vmem [shape: bf16[64,256], index: 1, kind: input, shape index: {}]   ;;  %s976_s2 = inlined_call_operand.vmem [shape: f32[1,256], index: 2, kind: input, shape index: {}]   ;;  %s977_s3 = inlined_call_operand.vmem [shape: bf16[256,64], index: 3, kind: input, shape index: {}]   ;;  %s978_s4 = inlined_call_operand.vmem [shape: f32[1,64], index: 4, kind: input, shape index: {}]   ;;  %s979_s5 = inlined_call_operand.hbm [shape: f32[16,64], index: 5, kind: output, shape index: {}]  }
   0x1   :  { %12 = vsyncpa [#allocation3 + $0x1], 0  ;;  %s801_s18 = smov 0   ;;  %s803_s19 = smov 0  }
   0x2   :  { %s805_s20 = smov 0   ;;  %s807_s21 = smov 0  }
   0x3 LB: > { %s822_s22 = sadd.s32 4294967295, %s767_s21   ;;  %s581_s23 = sadd.s32 4294967294, %s767_s21   ;;  %s767_s21 = sphi %s807_s21, %s985_s21   ;;  %s763_s20 = sphi %s805_s20, %s984_s20   ;;  %s759_s19 = sphi %s803_s19, %s983_s19   ;;  %s755_s18 = sphi %s801_s18, %s982_s18  }
   0x4   : > { %s826_s24 = sadd.s32 1, %s767_s21   ;;  %s135_s25 = sadd.s32 1, %s763_s20 }
   0x5   : > { %s132_s26 = ssub.s32 %s767_s21, %s826_s24  ;;  %p145_p0 = scmp.ne.s32.totalorder %s763_s20, %s759_s19 }
   0x6   : > { %p133_p1 = scmp.eq.s32.totalorder %s132_s26, 0  ;;  %p146_p2 = scmp.eq.s32.totalorder %s822_s22, 1 }
   0x7   : > { %p151_p3 = scmp.ne.s32.totalorder %s759_s19, %s755_s18  ;;  %p152_p4 = scmp.eq.s32.totalorder %s581_s23, 1 }
   0x8   : > { %s837_s27 = scalar_select %p133_p1, %s763_s20, %s135_s25  }
   0x9   : > { %p839_p5 = por %p146_p2, %p145_p0  ;;  %p843_p6 = por %p152_p4, %p151_p3 }
   0xa   : > { %p584_p7 = scmp.ge.s32.totalorder %s767_s21, 1  ;;  %p189_p8 = scmp.lt.s32.totalorder %s767_s21, 3 }
   0xc   : > { %p190_p9 = pnand %p584_p7, %p189_p8 }
   0xd   : > { %p216_p10 = scmp.lt.s32.totalorder (!%p190_p9), %s822_s22, 1  ;;  %s614_s16 = sshll.u32 (!%p190_p9), %s822_s22, 7 }
   0xe   : > { %193 = sbr.rel (%p190_p9) target bundleno = 450 (0x1c2), region = 40  ;;  %s938_s30 = scalar_lea.hbm (!%p190_p9), %s979_s5, %s614_s16 }
  0x13   : > { %v679_v0 = vld [vmem:[%s975_s1 + $0x34] ss:$8 sps:$4 sm:$0xff]   ;;  %v681_v1 = vld [vmem:[%s975_s1 + $0x30] ss:$8 sps:$4 sm:$0xff]   ;;  %v769_v2 = vmov 0   ;;  %s217_s11 = scalar_select %p216_p10, %s822_s22, 1  ;;  %v233_v27 = vlaneseq }
  0x14   : > { %319 = vmatprep.mubr.bf16.mxu0 %v769_v2  ;;  %295 = vmatprep.subr.bf16.mxu0 %v679_v0  ;;  %v682_v3 = vld [vmem:[%s975_s1 + $0x24] ss:$8 sps:$4 sm:$0xff]   ;;  %v684_v4 = vld [vmem:[%s975_s1 + $0x20] ss:$8 sps:$4 sm:$0xff]   ;;  %v685_v5 = vld [vmem:[%s975_s1 + $0x14] ss:$8 sps:$4 sm:$0xff]  }
  0x15   : > { %296 = vmatpush1.bf16.msra.mxu0 %v681_v1  ;;  %v687_v6 = vld [vmem:[%s975_s1 + $0x10] ss:$8 sps:$4 sm:$0xff]   ;;  %s586_s23 = sshll.u32 %s217_s11, 3  ;;  %v688_v7 = vld [vmem:[%s975_s1 + $0x4] ss:$8 sps:$4 sm:$0xff]   ;;  %vm283_vm0 = vcmask 523264  }
  0x16   : > { %297 = vmatprep.subr.bf16.mxu0 %v682_v3  ;;  %v691_v8 = vld [vmem:[%s977_s3 + $0x78] sm:$0xff]   ;;  %s219_s12 = scalar_lea.vmem %s974_s0, %s586_s23  ;;  %v693_v10 = vld [vmem:[%s977_s3 + $0x70] sm:$0xff]   ;;  %v690_v11 = vld [vmem:[%s975_s1] ss:$8 sps:$4 sm:$0xff]   ;;  %v234_v28 = vshrl.u32 %v233_v27, 7  ;;  %s213_s11 = sand.u32 1, %s759_s19  }
  0x17   : > { %v692_v9 = vld [vmem:[%s977_s3 + $0x38] sm:$0xff]   ;;  %617 = vmatprep.subr.bf16.mxu1 %v691_v8  ;;  %v694_v12 = vld [vmem:[%s977_s3 + $0x30] sm:$0xff]   ;;  %v695_v13 = vld [vmem:[%s977_s3 + $0x68] sm:$0xff]   ;;  %s585_s13 = sshll.u32 %s213_s11, 3  ;;  %s509_s6 = scalar_lea.sflag [#allocation3], %s213_s11 }
  0x18   : > { %618 = vmatpush3.bf16.msra.mxu1 %v692_v9  ;;  %v221_v14 = vld [vmem:[%s219_s12] sm:$0xff]  ;;  %v696_v15 = vld [vmem:[%s977_s3 + $0x28] sm:$0xff]   ;;  %v699_v19 = vld [vmem:[%s977_s3 + $0x58] sm:$0xff]   ;;  %v235_v29 = vsub.s32 0, %v234_v28  ;;  %v239_v31 = vsub.s32 1, %v234_v28  ;;  %s215_s17 = scalar_lea.vmem [#allocation2], %s585_s13 }
  0x19   : > { %298 = vmatpush1.bf16.msra.mxu0 %v684_v4  ;;  %619 = vmatprep.subr.bf16.mxu1 %v693_v10  ;;  %v222_v16 = vpack.c.bf16 %v221_v14, %v221_v14  ;;  %v697_v17 = vld [vmem:[%s977_s3 + $0x60] sm:$0xff]   ;;  %v700_v20 = vld [vmem:[%s977_s3 + $0x18] sm:$0xff]   ;;  %v701_v21 = vld [vmem:[%s977_s3 + $0x50] sm:$0xff]   ;;  %s522_s25 = sshll.u32 %s215_s17, 4  ;;  %s770_s22 = smov [#allocation2]   ;;  %s523_s25 = int_to_ptr.vmem [resolvable:$true] %s522_s25 }
  0x1a   : > { %299 = vmatprep.subr.bf16.mxu0 %v685_v5  ;;  %v698_v18 = vld [vmem:[%s977_s3 + $0x20] sm:$0xff]   ;;  %v702_v22 = vld [vmem:[%s977_s3 + $0x10] sm:$0xff]   ;;  %v703_v23 = vld [vmem:[%s977_s3 + $0x48] sm:$0xff]   ;;  %s707_s7 = scalar_lea.vmem %s523_s25, 128  ;;  %s711_s8 = sshll.u32 %s770_s22, 4  ;;  %s712_s8 = int_to_ptr.vmem [resolvable:$false] %s711_s8 }
  0x1b   : > { %v704_v24 = vld [vmem:[%s977_s3 + $0x8] sm:$0xff]   ;;  %v705_v25 = vld [vmem:[%s977_s3 + $0x40] sm:$0xff]   ;;  %p708_p11 = scmp.ne.s32.totalorder %s523_s25, %s707_s7  ;;  %s713_s9 = scalar_lea.vmem %s712_s8, 256 }
  0x1c   : > { %620 = vmatpush3.bf16.msra.mxu1 %v694_v12  ;;  %v706_v26 = vld [vmem:[%s977_s3] sm:$0xff]   ;;  %p714_p0 = scmp.lt.s32.totalorder %s523_s25, %s712_s8  ;;  %p715_p1 = scmp.lt.s32.totalorder %s713_s9, %s707_s7 }
  0x1d   : > { %300 = vmatpush1.bf16.msra.mxu0 %v687_v6  ;;  %621 = vmatprep.subr.bf16.mxu1 %v695_v13  ;;  %v231_v30 = vld [vmem:[%s976_s2] sm:$0x3]  ;;  %p709_p12 = pnand %p708_p11, %p839_p5 }
  0x1e   : > { %301 = vmatprep.subr.bf16.mxu0 %v688_v7  ;;  %v236_v32 = vrot.slane %v231_v30, %v235_v29  ;;  %v240_v33 = vrot.slane %v231_v30, %v239_v31  ;;  %v596_v45 = vld [vmem:[%s978_s4] ss:$0 sm:$0xff]  ;;  %p716_p2 = por %p715_p1, %p714_p0 }
  0x1f   : > { %p710_p13 = pneg %p709_p12 }
  0x20   : > { %622 = vmatpush3.bf16.msra.mxu1 %v696_v15 }
  0x21   : > { %302 = vmatpush1.bf16.msra.mxu0 %v690_v11  ;;  %623 = vmatprep.subr.bf16.mxu1 %v697_v17  ;;  %p717_p3 = pnand %p716_p2, %p710_p13 }
  0x24   : > { %595 = vmatmul.mubr.msk.bf16.vlgmr.msra.gmra.mxu0 %vm283_vm0, %v222_v16  ;;  %624 = vmatpush3.bf16.msra.mxu1 %v698_v18 }
  0x25   : > { %625 = vmatprep.subr.bf16.mxu1 %v699_v19 }
  0x28   : > { %626 = vmatpush3.bf16.msra.mxu1 %v700_v20 }
  0x29   : > { %627 = vmatprep.subr.bf16.mxu1 %v701_v21 }
  0x2c   : > { %628 = vmatpush3.bf16.msra.mxu1 %v702_v22 }
  0x2d   : > { %629 = vmatprep.subr.bf16.mxu1 %v703_v23 }
  0x30   : > { %630 = vmatpush3.bf16.msra.mxu1 %v704_v24 }
  0x31   : > { %631 = vmatprep.subr.bf16.mxu1 %v705_v25 }
  0x34   : > { %632 = vmatpush3.bf16.msra.mxu1 %v706_v26 }
  0xe4   : > { %v321_v34 = vpop.f32.mrf.mxu0 }
  0xe5   : > { %v322_v35 = vadd.f32 %v321_v34, %v236_v32 }
  0xe6   : > { %v323_v36 = vpop.f32.mrf.mxu0 }
  0xe7   : > { %v324_v37 = vadd.f32 %v323_v36, %v240_v33  ;;  %v328_v38 = vmax.f32 %v322_v35, 0.0 }
  0xe8   : > { %v325_v39 = vpop.f32.mrf.mxu0 }
  0xe9   : > { %v329_v40 = vmax.f32 %v324_v37, 0.0  ;;  %v330_v43 = vpack.c.bf16 %v328_v38, %v328_v38 }
  0xea   : > { %v326_v41 = vpop.f32.mrf.mxu0 }
  0xeb   : > { %v331_v42 = vpack.c.bf16 %v329_v40, %v329_v40 }
  0xed   : > { %499 = vmatprep.mubr.bf16.mxu1 %v331_v42 }
  0xee   : > { %500 = vmatmul.mubr.bf16.vlgmr.msra.gmra.mxu1 %v330_v43 }
 0x1ae   : > { %v633_v44 = vpop.f32.mrf.mxu1 }
 0x1b0   : > { %v634_v46 = vpop.f32.mrf.mxu1 }
 0x1b1   : > { %v635_v47 = vadd.f32 %v634_v46, %v633_v44 }
 0x1b2   : > { %v636_v48 = vpop.f32.mrf.mxu1 }
 0x1b3   : > { %v502_v49 = vadd.f32 %v635_v47, %v596_v45 }
 0x1b4   : > { %v637_v50 = vpop.f32.mrf.mxu1 }
 0x1b5   : > { %507 = vst.msk [vmem:[%s215_s17] sm:$0xff] %vm283_vm0, %v502_v49 }
 0x1b6   : > { %720 = shalt.err (!%p717_p3)
}
 0x1b7   : > { %s721_s10 = scalar_lea.hbm %s938_s30, 128  ;;  %s725_s13 = scalar_lea.hbm %s979_s5, 256 }
 0x1b8   : > { %p722_p4 = scmp.ne.s32.totalorder %s938_s30, %s721_s10  ;;  %p726_p9 = scmp.lt.s32.totalorder %s938_s30, %s979_s5 }
 0x1b9   : > { %p727_p10 = scmp.lt.s32.totalorder %s725_s13, %s721_s10 }
 0x1ba   : > { %p723_p7 = pnand %p722_p4, %p839_p5 }
 0x1bb   : > { %p728_p11 = por %p727_p10, %p726_p9 }
 0x1bc   : > { %p724_p8 = pneg %p723_p7 }
 0x1be   : > { %p729_p12 = pnand %p728_p11, %p724_p8 }
 0x1c0   : > { %732 = shalt.err (!%p729_p12)
}
 0x1c1   : > { %639 = dma.vmem_to_hbm [thread:$0]  (%p839_p5), %s523_s25, 128, %s938_s30, %s509_s6  }
 0x1c2 PF: > { %p645_p13 = scmp.ge.s32.totalorder %s767_s21, 2  ;;  %s534_s16 = sand.u32 1, %s755_s18  }
 0x1c3   : > { %s535_s17 = scalar_lea.sflag [#allocation3], %s534_s16 }
 0x1c4   : > { %p642_p0 = pnand %p645_p13, %p843_p6 }
 0x1c6   : > { %p643_p1 = pneg %p642_p0 }
 0x1c8   : > { %750 = dma.done.wait (%p643_p1), %s535_s17, 128  }
 0x1c9   : > { %752 = vsyncadd (%p643_p1), %s535_s17, 4294967168  ;;  %p15_p2 = scmp.ge.s32.totalorder %s826_s24, 4   ;;  %s982_s18 = smov %s759_s19 }
 0x1ca   : > { %s983_s19 = smov %s763_s20  ;;  %s984_s20 = smov %s837_s27 }
 0x1cb   : > { %s985_s21 = smov %s826_s24  ;;  %17 = sbr.rel (!%p15_p2) target bundleno = 3 (0x3), region = 75 }
 0x1d0   :  { %540 = vsyncpa [#allocation3], 1 }
 0x1d1   :  { %542 = vsyncpa [#allocation3 + $0x1], 1 }

</bundles_post_ra>
